<compile_context>
chip_gen: v5e
topology: v5e:2x2
jax: 0.10.0
libtpu: 0.0.40
codegen_flags: <defaults>
</compile_context>

<pallas_src>
import jax
import jax.numpy as jnp
from jax.experimental import pallas as pl
from jax.experimental.pallas import tpu as pltpu

KSIZE = 3  # CausalConv1d kernel_size (odd -> symmetric pad of `dilation` per side)


def _wavenet_stack_kernel(taps_ref, wfused_ref, wskip_ref, cond_ref, out_ref):
    """Grid: (layers, lane_tiles). One step = one WavenetResBlock on one lane tile.

    taps_ref  : (1, 3C, TN)      [left | center | right] dilated taps, lanes = b*L + t
    wfused_ref: (1, 2C, 3C)      rows 0:C = conv taps [k0|k1|k2]; rows C:2C = wskip@wres
                                 placed in the center-tap columns (residual path fused)
    wskip_ref : (1, C, C)
    cond_ref  : (1, BPT, C, 3)   per-batch [gamma | beta' | bskip'] columns
    out_ref   : (1, C, TN)       skip output slab
    """
    C = wskip_ref.shape[1]
    BPT = cond_ref.shape[1]
    TN = taps_ref.shape[2]
    L = TN // BPT

    # One fused MXU matmul: rows 0:C -> pre-FiLM conv output, rows C:2C -> (wskip@wres)@x.
    yz = jnp.dot(wfused_ref[0], taps_ref[0], preferred_element_type=jnp.float32)
    y = yz[:C]           # (C, TN)   conv bias is folded into beta'
    skip_part = yz[C:]   # (C, TN)   res bias is folded into bskip'

    # FiLM conditioning: per-batch, lane-aligned L-wide slices (BPT is tiny & static).
    cols = []
    for j in range(BPT):
        gam = cond_ref[0, j, :, 0:1]
        bet = cond_ref[0, j, :, 1:2]
        cols.append(y[:, j * L:(j + 1) * L] * gam + bet)
    y = cols[0] if BPT == 1 else jnp.concatenate(cols, axis=1)

    # Gated activation: tanh(y)*sigmoid(y) == (1 - e^-y) / (1 + e^-2y).
    # One EUP exp + one approx EUP reciprocal + one Newton step (restores ~f32 accuracy);
    # the clamp avoids u*u overflow for y << 0 (|gate| < 1e-13 there anyway).
    u = jnp.exp(-jnp.maximum(y, -30.0))
    den = 1.0 + u * u
    r = pl.reciprocal(den, approx=True)
    r = r * (2.0 - den * r)
    g = (1.0 - u) * r

    # skip = wskip @ g + (wskip@wres)@x + (wskip@bres + bskip)
    bsk = cond_ref[0, 0, :, 2:3]   # bskip' is per-channel (identical across batches)
    skip = jnp.dot(wskip_ref[0], g, preferred_element_type=jnp.float32) + skip_part + bsk
    out_ref[0] = skip.astype(out_ref.dtype)


def wavenet_stack_pallas(x, t, params, *, layers, max_tile_lanes=2048):
    """x: (B, C, L) channels-first; t: (B, C * dim_cond_mult).
    Returns the skip stack (layers, B, C, L) = torch.stack(skips) of WavenetStack
    with has_skip=True."""
    B, C, L = x.shape
    NL = B * L

    # ---------------- wrapper-side algebraic fusion & layout prep (tiny) ----------------
    # Time conditioning (hoisted B-row matmul): (layers, B, 2C) -> gamma, beta.
    tc = jnp.einsum("bi,lio->lbo", t, params["wt"]) + params["bt"][:, None, :]
    gamma = tc[..., :C]                                               # (layers, B, C)
    beta = tc[..., C:] + gamma * params["bconv"][:, None, :]          # fold conv bias
    # Residual path fused into skip: skip = wskip@g + (wskip@wres)@x + (wskip@bres+bskip).
    wsr = jnp.einsum("loi,lij->loj", params["wskip"], params["wres"])           # (l,C,C)
    bskip_f = jnp.einsum("loi,li->lo", params["wskip"], params["bres"]) + params["bskip"]
    # Fused (2C, 3C) weight: top = conv taps grouped [k0|k1|k2]; bottom = wsr in the
    # center-tap columns (so one matmul against taps yields both y and skip_part).
    wconv_f = jnp.transpose(params["wconv"], (0, 2, 1, 3)).reshape(layers, C, KSIZE * C)
    wsr_pad = jnp.pad(wsr, ((0, 0), (0, 0), (C, C)))                  # (layers, C, 3C)
    w_fused = jnp.concatenate([wconv_f, wsr_pad], axis=1)             # (layers, 2C, 3C)
    wskip = params["wskip"]                                           # (layers, C, C)
    # Packed per-(layer,batch) conditioning slab: [gamma | beta' | bskip'].
    cond = jnp.stack(
        [gamma, beta, jnp.broadcast_to(bskip_f[:, None, :], (layers, B, C))], axis=-1
    )                                                                 # (layers, B, C, 3)

    # Per-layer dilated taps (the lane-misaligned gather is done ONCE here by XLA,
    # not inside the kernel): (layers, 3C, B*L) with lane index = b*L + t.
    taps_list = []
    for i in range(layers):
        d = 2 ** i
        xp = jnp.pad(x, ((0, 0), (0, 0), (d, d)))
        left, right = xp[:, :, :L], xp[:, :, 2 * d:]
        ti = jnp.concatenate([left, x, right], axis=1)                # (B, 3C, L)
        taps_list.append(jnp.transpose(ti, (1, 0, 2)).reshape(KSIZE * C, NL))
    taps = jnp.stack(taps_list)                                       # (layers, 3C, B*L)

    # Lane-tile selection: whole batches per tile so FiLM slices stay lane-aligned.
    # TODO(synk): intra-batch L tiling (TN < L) for very long audio; needs per-tile
    #             batch lookup for gamma/beta and per-tile tap construction.
    BPT = 1
    for cand in range(B, 0, -1):
        if B % cand == 0 and cand * L <= max_tile_lanes:
            BPT = cand
            break
    TN = BPT * L
    NT = B // BPT

    out = pl.pallas_call(
        _wavenet_stack_kernel,
        grid_spec=pltpu.PrefetchScalarGridSpec(
            num_scalar_prefetch=0,
            grid=(layers, NT),
            in_specs=[
                pl.BlockSpec((1, KSIZE * C, TN), lambda l, n: (l, 0, n)),     # taps
                pl.BlockSpec((1, 2 * C, KSIZE * C), lambda l, n: (l, 0, 0)),  # fused W
                pl.BlockSpec((1, C, C), lambda l, n: (l, 0, 0)),              # skip W
                pl.BlockSpec((1, BPT, C, 3), lambda l, n: (l, n, 0, 0)),      # cond slab
            ],
            out_specs=pl.BlockSpec((1, C, TN), lambda l, n: (l, 0, n)),
        ),
        out_shape=jax.ShapeDtypeStruct((layers, C, NL), jnp.float32),
        compiler_params=pltpu.CompilerParams(
            dimension_semantics=("parallel", "parallel")),
    )(taps, w_fused, wskip, cond)

    # Layout plumbing back to the PyTorch stacked-skip shape (layers, B, C, L).
    # TODO(synk): cast MXU operands (taps / w_fused / wskip) to bf16 with f32
    #             accumulation for production; kept f32 here to hold the 1e-4 check.
    return out.reshape(layers, C, B, L).transpose(0, 2, 1, 3)


def wavenet_stack_ref(x, t, params, *, layers):
    """Pure-JAX reference mirroring the PyTorch forward (channels-first layout)."""
    B, C, L = x.shape
    skips = []
    for i in range(layers):
        d = 2 ** i
        tc = t @ params["wt"][i] + params["bt"][i]           # (B, 2C)
        gamma, beta = tc[:, :C, None], tc[:, C:, None]       # (B, C, 1)
        res = jnp.einsum("oi,bil->bol", params["wres"][i], x) + params["bres"][i][None, :, None]
        xp = jnp.pad(x, ((0, 0), (0, 0), (d, d)))
        y = sum(jnp.einsum("oi,bil->bol", params["wconv"][i, k], xp[:, :, k * d:k * d + L])
                for k in range(KSIZE))
        y = y + params["bconv"][i][None, :, None]
        y = y * gamma + beta
        g = jnp.tanh(y) * jax.nn.sigmoid(y)
        o = g + res
        skips.append(jnp.einsum("oi,bil->bol", params["wskip"][i], o)
                     + params["bskip"][i][None, :, None])
    return jnp.stack(skips)


def init_params(key, dim, layers, dim_cond_mult):
    Ct = dim * dim_cond_mult
    ks = jax.random.split(key, 8)
    s = 0.1
    return {
        "wt":    jax.random.normal(ks[0], (layers, Ct, 2 * dim), jnp.float32) * s,
        "bt":    jax.random.normal(ks[1], (layers, 2 * dim), jnp.float32) * s,
        "wconv": jax.random.normal(ks[2], (layers, KSIZE, dim, dim), jnp.float32) * s,
        "bconv": jax.random.normal(ks[3], (layers, dim), jnp.float32) * s,
        "wres":  jax.random.normal(ks[4], (layers, dim, dim), jnp.float32) * s,
        "bres":  jax.random.normal(ks[5], (layers, dim), jnp.float32) * s,
        "wskip": jax.random.normal(ks[6], (layers, dim, dim), jnp.float32) * s,
        "bskip": jax.random.normal(ks[7], (layers, dim), jnp.float32) * s,
    }


if __name__ == "__main__":
    dim = 32            # channels
    layers = 3          # dilations 1, 2, 4
    dim_cond_mult = 4   # time-conditioning input dim = 128
    B, L = 2, 128       # B*L = 256 lanes -> unmasked 2x128-wide stores

    key = jax.random.PRNGKey(0)
    kx, kt, kp = jax.random.split(key, 3)
    x = jax.random.normal(kx, (B, dim, L), jnp.float32)            # channels-first (NCL)
    t = jax.random.normal(kt, (B, dim * dim_cond_mult), jnp.float32)
    params = init_params(kp, dim, layers, dim_cond_mult)

    skip_stack = wavenet_stack_pallas(x, t, params, layers=layers)
    jax.block_until_ready(skip_stack)

    skip_ref = wavenet_stack_ref(x, t, params, layers=layers)
    assert skip_stack.shape == (layers, B, dim, L)
    assert jnp.allclose(skip_stack, skip_ref, rtol=1e-4, atol=1e-4), "skip mismatch"

    print("KERNEL_OK")
</pallas_src>

<mosaic_0001>
module attributes {stable_mosaic.version = 11 : i64} {
  func.func @_wavenet_stack_kernel(%arg0: i32, %arg1: i32, %arg2: memref<1x96x256xf32, #tpu.memory_space<vmem>>, %arg3: memref<1x64x96xf32, #tpu.memory_space<vmem>>, %arg4: memref<1x32x32xf32, #tpu.memory_space<vmem>>, %arg5: memref<1x2x32x3xf32, #tpu.memory_space<vmem>>, %arg6: memref<1x32x256xf32, #tpu.memory_space<vmem>>) attributes {dimension_semantics = [#tpu.dimension_semantics<parallel>, #tpu.dimension_semantics<parallel>], iteration_bounds = array<i64: 3, 1>, scalar_prefetch = 0 : i64, scratch_operands = 0 : i64, tpu.core_type = #tpu.core_type<tc>, window_params = [{transform_indices = @transform_0, window_bounds = array<i64: 1, 96, 256>}, {transform_indices = @transform_1, window_bounds = array<i64: 1, 64, 96>}, {transform_indices = @transform_2, window_bounds = array<i64: 1, 32, 32>}, {transform_indices = @transform_3, window_bounds = array<i64: 1, 2, 32, 3>}, {transform_indices = @transform_4, window_bounds = array<i64: 1, 32, 256>}]} {
    %c0 = arith.constant 0 : index
    %c0_0 = arith.constant 0 : index
    %c0_1 = arith.constant 0 : index
    %0 = vector.load %arg3[%c0, %c0_0, %c0_1] : memref<1x64x96xf32, #tpu.memory_space<vmem>>, vector<1x64x96xf32>
    %1 = vector.shape_cast %0 : vector<1x64x96xf32> to vector<64x96xf32>
    %c0_2 = arith.constant 0 : index
    %c0_3 = arith.constant 0 : index
    %c0_4 = arith.constant 0 : index
    %2 = vector.load %arg2[%c0_2, %c0_3, %c0_4] : memref<1x96x256xf32, #tpu.memory_space<vmem>>, vector<1x96x256xf32>
    %3 = vector.shape_cast %2 : vector<1x96x256xf32> to vector<96x256xf32>
    %cst = arith.constant dense<0.000000e+00> : vector<64x256xf32>
    %4 = tpu.matmul %1, %3, %cst {dimension_numbers = #tpu.dot_dimension_numbers<[1], [0], [0], [1], [0, 0, 1, 1], [], []>} : vector<64x96xf32>, vector<96x256xf32>, vector<64x256xf32> -> vector<64x256xf32>
    %5 = vector.extract_strided_slice %4 {offsets = [0, 0], sizes = [32, 256], strides = [1, 1]} : vector<64x256xf32> to vector<32x256xf32>
    %6 = vector.extract_strided_slice %4 {offsets = [32, 0], sizes = [32, 256], strides = [1, 1]} : vector<64x256xf32> to vector<32x256xf32>
    %c0_5 = arith.constant 0 : index
    %c0_6 = arith.constant 0 : index
    %c0_7 = arith.constant 0 : index
    %c0_8 = arith.constant 0 : index
    %7 = vector.load %arg5[%c0_5, %c0_6, %c0_7, %c0_8] : memref<1x2x32x3xf32, #tpu.memory_space<vmem>>, vector<1x1x32x1xf32>
    %8 = vector.shape_cast %7 : vector<1x1x32x1xf32> to vector<32x1xf32>
    %c0_9 = arith.constant 0 : index
    %c0_10 = arith.constant 0 : index
    %c0_11 = arith.constant 0 : index
    %c1 = arith.constant 1 : index
    %9 = vector.load %arg5[%c0_9, %c0_10, %c0_11, %c1] : memref<1x2x32x3xf32, #tpu.memory_space<vmem>>, vector<1x1x32x1xf32>
    %10 = vector.shape_cast %9 : vector<1x1x32x1xf32> to vector<32x1xf32>
    %11 = vector.extract_strided_slice %5 {offsets = [0, 0], sizes = [32, 128], strides = [1, 1]} : vector<32x256xf32> to vector<32x128xf32>
    %12 = vector.broadcast %8 : vector<32x1xf32> to vector<32x128xf32>
    %13 = arith.mulf %11, %12 : vector<32x128xf32>
    %14 = vector.broadcast %10 : vector<32x1xf32> to vector<32x128xf32>
    %15 = arith.addf %13, %14 : vector<32x128xf32>
    %c0_12 = arith.constant 0 : index
    %c1_13 = arith.constant 1 : index
    %c0_14 = arith.constant 0 : index
    %c0_15 = arith.constant 0 : index
    %16 = vector.load %arg5[%c0_12, %c1_13, %c0_14, %c0_15] : memref<1x2x32x3xf32, #tpu.memory_space<vmem>>, vector<1x1x32x1xf32>
    %17 = vector.shape_cast %16 : vector<1x1x32x1xf32> to vector<32x1xf32>
    %c0_16 = arith.constant 0 : index
    %c1_17 = arith.constant 1 : index
    %c0_18 = arith.constant 0 : index
    %c1_19 = arith.constant 1 : index
    %18 = vector.load %arg5[%c0_16, %c1_17, %c0_18, %c1_19] : memref<1x2x32x3xf32, #tpu.memory_space<vmem>>, vector<1x1x32x1xf32>
    %19 = vector.shape_cast %18 : vector<1x1x32x1xf32> to vector<32x1xf32>
    %20 = vector.extract_strided_slice %5 {offsets = [0, 128], sizes = [32, 128], strides = [1, 1]} : vector<32x256xf32> to vector<32x128xf32>
    %21 = vector.broadcast %17 : vector<32x1xf32> to vector<32x128xf32>
    %22 = arith.mulf %20, %21 : vector<32x128xf32>
    %23 = vector.broadcast %19 : vector<32x1xf32> to vector<32x128xf32>
    %24 = arith.addf %22, %23 : vector<32x128xf32>
    %25 = tpu.concatenate %15, %24 in 1 : vector<32x128xf32>, vector<32x128xf32> -> vector<32x256xf32>
    %cst_20 = arith.constant -3.000000e+01 : f32
    %26 = vector.broadcast %cst_20 : f32 to vector<32x256xf32>
    %27 = arith.maximumf %25, %26 : vector<32x256xf32>
    %cst_21 = arith.constant 0.000000e+00 : f32
    %28 = vector.broadcast %cst_21 : f32 to vector<32x256xf32>
    %29 = arith.subf %28, %27 : vector<32x256xf32>
    %30 = math.exp %29 : vector<32x256xf32>
    %31 = arith.mulf %30, %30 : vector<32x256xf32>
    %cst_22 = arith.constant 1.000000e+00 : f32
    %32 = vector.broadcast %cst_22 : f32 to vector<32x256xf32>
    %33 = arith.addf %32, %31 : vector<32x256xf32>
    %34 = tpu.reciprocal %33 {approx = true} : vector<32x256xf32> -> vector<32x256xf32>
    %35 = arith.mulf %33, %34 : vector<32x256xf32>
    %cst_23 = arith.constant 2.000000e+00 : f32
    %36 = vector.broadcast %cst_23 : f32 to vector<32x256xf32>
    %37 = arith.subf %36, %35 : vector<32x256xf32>
    %38 = arith.mulf %34, %37 : vector<32x256xf32>
    %cst_24 = arith.constant 1.000000e+00 : f32
    %39 = vector.broadcast %cst_24 : f32 to vector<32x256xf32>
    %40 = arith.subf %39, %30 : vector<32x256xf32>
    %41 = arith.mulf %40, %38 : vector<32x256xf32>
    %c0_25 = arith.constant 0 : index
    %c0_26 = arith.constant 0 : index
    %c0_27 = arith.constant 0 : index
    %c2 = arith.constant 2 : index
    %42 = vector.load %arg5[%c0_25, %c0_26, %c0_27, %c2] : memref<1x2x32x3xf32, #tpu.memory_space<vmem>>, vector<1x1x32x1xf32>
    %43 = vector.shape_cast %42 : vector<1x1x32x1xf32> to vector<32x1xf32>
    %c0_28 = arith.constant 0 : index
    %c0_29 = arith.constant 0 : index
    %c0_30 = arith.constant 0 : index
    %44 = vector.load %arg4[%c0_28, %c0_29, %c0_30] : memref<1x32x32xf32, #tpu.memory_space<vmem>>, vector<1x32x32xf32>
    %45 = vector.shape_cast %44 : vector<1x32x32xf32> to vector<32x32xf32>
    %cst_31 = arith.constant dense<0.000000e+00> : vector<32x256xf32>
    %46 = tpu.matmul %45, %41, %cst_31 {dimension_numbers = #tpu.dot_dimension_numbers<[1], [0], [0], [1], [0, 0, 1, 1], [], []>} : vector<32x32xf32>, vector<32x256xf32>, vector<32x256xf32> -> vector<32x256xf32>
    %47 = arith.addf %46, %6 : vector<32x256xf32>
    %48 = vector.broadcast %43 : vector<32x1xf32> to vector<32x256xf32>
    %49 = arith.addf %47, %48 : vector<32x256xf32>
    %c0_32 = arith.constant 0 : index
    %c0_33 = arith.constant 0 : index
    %c0_34 = arith.constant 0 : index
    %50 = vector.load %arg6[%c0_32, %c0_33, %c0_34] : memref<1x32x256xf32, #tpu.memory_space<vmem>>, vector<1x32x256xf32>
    %51 = vector.shape_cast %50 : vector<1x32x256xf32> to vector<32x256xf32>
    %52 = vector.shape_cast %49 : vector<32x256xf32> to vector<1x32x256xf32>
    tpu.vector_store %arg6[%c0_32, %c0_33, %c0_34], %52 {strides = array<i32>} : memref<1x32x256xf32, #tpu.memory_space<vmem>>, vector<1x32x256xf32>,
    return
  }
  func.func @transform_0(%arg0: i32, %arg1: i32) -> (i32, i32, i32) {
    %c0_i32 = arith.constant 0 : i32
    %c0_i32_0 = arith.constant 0 : i32
    return %arg0, %c0_i32, %arg1 : i32, i32, i32
  }
  func.func @transform_1(%arg0: i32, %arg1: i32) -> (i32, i32, i32) {
    %c0_i32 = arith.constant 0 : i32
    %c0_i32_0 = arith.constant 0 : i32
    %c0_i32_1 = arith.constant 0 : i32
    return %arg0, %c0_i32, %c0_i32_0 : i32, i32, i32
  }
  func.func @transform_2(%arg0: i32, %arg1: i32) -> (i32, i32, i32) {
    %c0_i32 = arith.constant 0 : i32
    %c0_i32_0 = arith.constant 0 : i32
    %c0_i32_1 = arith.constant 0 : i32
    return %arg0, %c0_i32, %c0_i32_0 : i32, i32, i32
  }
  func.func @transform_3(%arg0: i32, %arg1: i32) -> (i32, i32, i32, i32) {
    %c0_i32 = arith.constant 0 : i32
    %c0_i32_0 = arith.constant 0 : i32
    %c0_i32_1 = arith.constant 0 : i32
    return %arg0, %arg1, %c0_i32, %c0_i32_0 : i32, i32, i32, i32
  }
  func.func @transform_4(%arg0: i32, %arg1: i32) -> (i32, i32, i32) {
    %c0_i32 = arith.constant 0 : i32
    %c0_i32_0 = arith.constant 0 : i32
    return %arg0, %c0_i32, %arg1 : i32, i32, i32
  }
}

</mosaic_0001>

<bundles_post_ra>
// kernel: tpu_custom_call.1
= control target key start
LH: loop header
LB: loop body
LE: loop exit
PB: predicated region body
PF: predicated region fallthrough
CT: control target
= control target key end

     0   :  { %s1632_s0 = inlined_call_operand.hbm [shape: f32[3,96,256], index: 0, kind: input, shape index: {}]   ;;  %s1633_s1 = inlined_call_operand.vmem [shape: f32[3,64,96], index: 1, kind: input, shape index: {}]   ;;  %s1634_s2 = inlined_call_operand.hbm [shape: f32[3,32,32], index: 2, kind: input, shape index: {}]   ;;  %s1635_s3 = inlined_call_operand.vmem [shape: f32[3,2,32,3], index: 3, kind: input, shape index: {}]   ;;  %s1636_s4 = inlined_call_operand.hbm [shape: f32[3,32,256], index: 4, kind: output, shape index: {}]  }
   0x1   :  { %1638 = sst [smem:[#allocation13_spill]] %s1632_s0 }
   0x2   :  { %9 = vsyncpa [#allocation3], 0 }
   0x3   :  { %11 = vsyncpa [#allocation3 + $0x1], 0 }
   0x4   :  { %12 = vsyncpa [#allocation6], 0 }
   0x5   :  { %14 = vsyncpa [#allocation6 + $0x1], 0 }
   0x6   :  { %15 = vsyncpa [#allocation4], 0 }
   0x7   :  { %17 = vsyncpa [#allocation4 + $0x1], 0  ;;  %s1321_s15 = smov 0   ;;  %s1323_s16 = smov 0  }
   0x8   :  { %s1325_s17 = smov 0   ;;  %s1327_s18 = smov 0  }
   0x9   :  { %s1329_s19 = smov 0   ;;  %s1331_s20 = smov 0  }
   0xa LB: > { %s939_s21 = sadd.s32 4294967295, %s1285_s20   ;;  %s940_s22 = sadd.s32 4294967294, %s1285_s20   ;;  %s1285_s20 = sphi %s1331_s20, %s23_s20   ;;  %s1281_s19 = sphi %s1329_s19, %s1653_s19   ;;  %s1277_s18 = sphi %s1327_s18, %s1652_s18   ;;  %s1273_s17 = sphi %s1325_s17, %s1651_s17   ;;  %s1269_s16 = sphi %s1323_s16, %s1650_s16   ;;  %s1265_s15 = sphi %s1321_s15, %s1649_s15  }
   0xb   : > { %s35_s23 = sadd.s32 1, %s1281_s19  ;;  %s44_s24 = sadd.s32 1, %s1273_s17 }
   0xc   : > { %p37_p0 = scmp.ge.s32.totalorder %s35_s23, 3  ;;  %p51_p1 = scmp.ne.s32.totalorder %s1273_s17, %s1269_s16 }
   0xd   : > { %p52_p2 = scmp.eq.s32.totalorder %s1285_s20, 0  ;;  %p57_p3 = scmp.ne.s32.totalorder %s1269_s16, %s1265_s15 }
   0xe   : > { %s1655_s23 = smov (%p37_p0, %s35_s23), 0  ;;  %p58_p5 = scmp.eq.s32.totalorder %s939_s21, 0 }
   0xf   : > { %1639 = sst [smem:[#allocation11_spill]] %s1655_s23  ;;  %p1362_p4 = por %p52_p2, %p51_p1 }
  0x10   : > { %s39_s26 = ssub.s32 %s1281_s19, %s1655_s23  ;;  %p163_p6 = scmp.eq.s32.totalorder %s939_s21, 2 }
  0x11   : > { %p42_p7 = scmp.eq.s32.totalorder %s39_s26, 0  ;;  %p1368_p8 = por %p58_p5, %p57_p3 }
  0x12   : > { %p1372_p9 = por %p163_p6, %p51_p1  ;;  %p169_p10 = scmp.eq.s32.totalorder %s940_s22, 2 }
  0x13   : > { %s1377_s29 = scalar_select %p42_p7, %s1273_s17, %s44_s24  }
  0x14   : > { %p1379_p11 = por %p169_p10, %p57_p3  ;;  %p1035_p12 = scmp.lt.s32.totalorder %s1285_s20, 3 }
  0x15   : > { %1643 = sst [smem:[#allocation12_spill]] %s1377_s29  ;;  %s1385_s5 = sand.u32 1, %s1273_s17  }
  0x16   : > { %s1015_s6 = smul.u32 192, %s1385_s5  ;;  %p1391_p13 = pnand %p1035_p12, %p1362_p4 }
  0x17   : > { %s1016_s7 = smul.u32 192, %s1281_s19  ;;  %s1646_s0 = sld [smem:[#allocation13_spill]] }
  0x18   : > { %s193_s12 = scalar_lea.vmem [#allocation2], %s1015_s6  ;;  %p947_p0 = scmp.ge.s32.totalorder %s1285_s20, 1 }
  0x19   : > { %s203_s13 = sshll.u32 %s193_s12, 4  ;;  %s190_s21 = scalar_lea.sflag [#allocation3], %s1385_s5  ;;  %s204_s13 = int_to_ptr.vmem [resolvable:$true] %s203_s13 }
  0x1a   : > { %s1287_s22 = smov 256   ;;  %s1288_s24 = smov 16  }
  0x1b   : > { %p255_p1 = scmp.lt.s32.totalorder %s1285_s20, 4  ;;  %s944_s25 = sshll.u32 %s1385_s5, 5 }
  0x1c   : > { %s987_s26 = sshll.u32 %s1281_s19, 5  ;;  %s1289_s23 = smov 128  }
  0x1d   : > { %s200_s11 = scalar_lea.hbm %s1646_s0, %s1016_s7  ;;  %p256_p2 = pnand %p947_p0, %p255_p1 }
  0x1e   : > { %s201_s14 = sshll.u32 %s200_s11, 4  ;;  %s230_s6 = scalar_lea.hbm %s1634_s2, %s987_s26  ;;  %s202_s14 = int_to_ptr.hbm [resolvable:$true] %s201_s14 }
  0x1f   : > { %1027 = dma.hbm_to_vmem [thread:$0]  (!%p1391_p13), %s202_s14, 3072, %s204_s13, %s190_s21, %s1287_s22, %s1287_s22, %s1288_s24  }
  0x20   : > { %s225_s7 = scalar_lea.vmem [#allocation5], %s944_s25  ;;  %s231_s12 = sshll.u32 %s230_s6, 4  ;;  %s232_s12 = int_to_ptr.hbm [resolvable:$true] %s231_s12 }
  0x21   : > { %s233_s11 = sshll.u32 %s225_s7, 4  ;;  %s222_s0 = scalar_lea.sflag [#allocation6], %s1385_s5  ;;  %s234_s11 = int_to_ptr.vmem [resolvable:$true] %s233_s11 }
  0x22   : > { %s1290_s29 = smov 8   ;;  %259 = sbr.rel (%p256_p2) target bundleno = 428 (0x1ac), region = 36 }
  0x23   : > { %1030 = dma.hbm_to_vmem [thread:$0]  (!%p1391_p13), %s232_s12, 512, %s234_s11, %s222_s0, %s1289_s23, %s1289_s23, %s1290_s29  }
  0x24   : > { %s1412_s13 = sand.u32 (!%p256_p2), 1, %s1269_s16  }
  0x25   : > { %s1017_s14 = smul.u32 (!%p256_p2), 192, %s1412_s13  ;;  %s262_s21 = scalar_lea.sflag (!%p256_p2), [#allocation3], %s1412_s13 }
  0x27   : > { %s1416_s22 = scalar_lea.vmem [#allocation2], %s1017_s14 }
  0x28   : > { %1252 = dma.done.wait (%p1368_p8), %s262_s21, 3072  }
  0x29   : > { %1254 = vsyncadd (%p1368_p8), %s262_s21, 4294964224  ;;  %s948_s0 = sshll.u32 %s1412_s13, 5  ;;  %s272_s23 = scalar_lea.sflag [#allocation6], %s1412_s13 }
  0x2a   : > { %s1424_s29 = scalar_lea.vmem [#allocation5], %s948_s0 }
  0x2b   : > { %1256 = dma.done.wait (%p1368_p8), %s272_s23, 512  }
  0x2c   : > { %1258 = vsyncadd (%p1368_p8), %s272_s23, 4294966784  ;;  %p322_p3 = scmp.lt.s32.totalorder %s1277_s18, 2  ;;  %v1291_v0 = vmov 0   ;;  %v369_v2 = vld [vmem:[%s1416_s22 + $0xb0] sm:$0xff]  ;;  %v370_v3 = vld [vmem:[%s1416_s22 + $0xb8] sm:$0xff]  ;;  %v1292_v15 = vmov 1  }
  0x2d   : > { %1095 = vset.pattern.permute.xlu1 %v1291_v0  ;;  %1094 = vset.pattern.permute.xlu0 %v1291_v0  ;;  %v367_v4 = vld [vmem:[%s1416_s22 + $0xa0] sm:$0xff]  ;;  %v368_v5 = vld [vmem:[%s1416_s22 + $0xa8] sm:$0xff]  ;;  %v365_v7 = vld [vmem:[%s1416_s22 + $0x90] sm:$0xff]  ;;  %vm371_vm0 = vcmask 785408   ;;  %vm675_vm1 = vcmask 261120   ;;  %s949_s6 = sshll.u32 %s1412_s13, 6 }
  0x2e   : > { %s1434_s5 = scalar_select %p322_p3, %s1277_s18, 2  ;;  %1097 = vset.pattern.permute.xlu2 %v1291_v0  ;;  %400 = vmatpush.msra.mxu0 %v369_v2  ;;  %v366_v8 = vld [vmem:[%s1416_s22 + $0x98] sm:$0xff]  ;;  %v363_v9 = vld [vmem:[%s1416_s22 + $0x80] sm:$0xff]  ;;  %v364_v10 = vld [vmem:[%s1416_s22 + $0x88] sm:$0xff] }
  0x2f   : > { %441 = vmatpush.msra.mxu1 %v370_v3  ;;  %991 = vmatpush.msra.mxu2 %v369_v2  ;;  %v361_v11 = vld [vmem:[%s1416_s22 + $0x70] sm:$0xff]  ;;  %v362_v12 = vld [vmem:[%s1416_s22 + $0x78] sm:$0xff]  ;;  %v359_v13 = vld [vmem:[%s1416_s22 + $0x60] sm:$0xff]  ;;  %s1584_s7 = scalar_lea.vmem [#allocation7], %s949_s6  ;;  %s990_s11 = sshll.u32 %s1277_s18, 6 }
  0x30   : > { %s988_s27 = sshll.u32 %s1434_s5, 6  ;;  %401 = vmatpush.msra.mxu0 %v367_v4  ;;  %1003 = vmatpush.msra.mxu3 %v370_v3  ;;  %v360_v16 = vld [vmem:[%s1416_s22 + $0x68] sm:$0xff]  ;;  %v357_v17 = vld [vmem:[%s1416_s22 + $0x50] sm:$0xff]  ;;  %v358_v18 = vld [vmem:[%s1416_s22 + $0x58] sm:$0xff]  ;;  %s792_s21 = scalar_lea.hbm %s1636_s4, %s990_s11 }
  0x31   : > { %s1443_s25 = scalar_lea.vmem %s1635_s3, %s988_s27  ;;  %442 = vmatpush.msra.mxu1 %v368_v5  ;;  %992 = vmatpush.msra.mxu2 %v367_v4  ;;  %v355_v20 = vld [vmem:[%s1416_s22 + $0x40] sm:$0xff]  ;;  %v356_v21 = vld [vmem:[%s1416_s22 + $0x48] sm:$0xff]  ;;  %v353_v22 = vld [vmem:[%s1416_s22 + $0x30] sm:$0xff]  ;;  %s1487_s10 = scalar_lea.vmem %s1633_s1, %s988_s27 }
  0x32   : > { %v1446_v1 = vld [vmem:[%s1443_s25 + $0x10] sm:$0xff]  ;;  %v1454_v6 = vld [vmem:[%s1443_s25 + $0x18] sm:$0xff]  ;;  %402 = vmatpush.msra.mxu0 %v365_v7  ;;  %1004 = vmatpush.msra.mxu3 %v368_v5  ;;  %v351_v24 = vld [vmem:[%s1416_s22 + $0x20] sm:$0xff]  ;;  %s795_s0 = sshll.u32 %s792_s21, 4  ;;  %s779_s18 = scalar_lea.sflag [#allocation4], %s1412_s13  ;;  %s796_s0 = int_to_ptr.hbm [resolvable:$true] %s795_s0 }
  0x33   : > { %494 = vperm.xlu1 %1095, %v1446_v1   ;;  %499 = vperm.xlu0 %1094, %v1454_v6   ;;  %v973_v14 = vld [vmem:[%s1443_s25 + $0x38] sm:$0xff]  ;;  %v972_v19 = vld [vmem:[%s1443_s25 + $0x30] sm:$0xff]  ;;  %v1477_v25 = vld [vmem:[%s1443_s25 + $0x8] sm:$0xff]  ;;  %s1213_s23 = sshra.s32 %s796_s0, 4  ;;  %s1219_s8 = scalar_lea.hbm %s1636_s4, 192  ;;  %s1214_s23 = int_to_ptr.hbm [resolvable:$true] %s1213_s23 }
  0x34   : > { %443 = vmatpush.msra.mxu1 %v366_v8  ;;  %403 = vmatpush.msra.mxu0 %v363_v9  ;;  %v354_v23 = vld [vmem:[%s1416_s22 + $0x38] sm:$0xff]  ;;  %v352_v26 = vld [vmem:[%s1416_s22 + $0x28] sm:$0xff]  ;;  %v349_v27 = vld [vmem:[%s1416_s22 + $0x10] sm:$0xff]  ;;  %p1220_p7 = scmp.lt.s32.totalorder %s1214_s23, %s1636_s4 }
  0x35   : > { %993 = vmatpush.msra.mxu2 %v365_v7  ;;  %1005 = vmatpush.msra.mxu3 %v366_v8  ;;  %v350_v28 = vld [vmem:[%s1416_s22 + $0x18] sm:$0xff]  ;;  %v347_v29 = vld [vmem:[%s1416_s22] sm:$0xff]  ;;  %v348_v30 = vld [vmem:[%s1416_s22 + $0x8] sm:$0xff]  ;;  %s793_s22 = sshll.u32 %s1584_s7, 4  ;;  %s794_s22 = int_to_ptr.vmem [resolvable:$true] %s793_s22 }
  0x36   : > { %444 = vmatpush.msra.mxu1 %v364_v10  ;;  %404 = vmatpush.msra.mxu0 %v361_v11  ;;  %v339_v31 = vld [vmem:[%s1487_s10] sm:$0xff]  ;;  %v971_v33 = vld [vmem:[%s1443_s25 + $0x28] sm:$0xff]  ;;  %v341_v36 = vld [vmem:[%s1487_s10 + $0x10] sm:$0xff] }
  0x37   : > { %543 = vperm.xlu2 %1097, %v972_v19   ;;  %994 = vmatpush.msra.mxu2 %v363_v9  ;;  %v1497_v32 = vld [vmem:[%s1443_s25] sm:$0xff]  ;;  %v340_v34 = vld [vmem:[%s1487_s10 + $0x8] sm:$0xff]  ;;  %v342_v37 = vld [vmem:[%s1487_s10 + $0x18] sm:$0xff] }
  0x38   : > { %445 = vmatpush.msra.mxu1 %v362_v12  ;;  %405 = vmatpush.msra.mxu0 %v359_v13  ;;  %v970_v35 = vld [vmem:[%s1443_s25 + $0x20] sm:$0xff]  ;;  %v345_v55 = vld [vmem:[%s1487_s10 + $0x30] sm:$0xff]  ;;  %v346_v2 = vld [vmem:[%s1487_s10 + $0x38] sm:$0xff] }
  0x39   : > { %1006 = vmatpush.msra.mxu3 %v364_v10  ;;  %995 = vmatpush.msra.mxu2 %v361_v11 }
  0x3a   : > { %446 = vmatpush.msra.mxu1 %v360_v16  ;;  %406 = vmatpush.msra.mxu0 %v357_v17 }
  0x3b   : > { %1096 = vset.pattern.permute.xlu1 %v1292_v15  ;;  %548 = vperm.xlu0 %1094, %v973_v14  }
  0x3c   : > { %519 = vperm.xlu1 %1096, %v1454_v6   ;;  %447 = vmatpush.msra.mxu1 %v358_v18 }
  0x3d   : > { %407 = vmatpush.msra.mxu0 %v355_v20  ;;  %1007 = vmatpush.msra.mxu3 %v362_v12 }
  0x3e   : > { %448 = vmatpush.msra.mxu1 %v356_v21  ;;  %996 = vmatpush.msra.mxu2 %v359_v13 }
  0x3f   : > { %408 = vmatpush.msra.mxu0 %v353_v22  ;;  %1098 = vset.pattern.permute.xlu2 %v1292_v15 }
  0x40   : > { %449 = vmatpush.msra.mxu1 %v354_v23  ;;  %568 = vperm.xlu2 %1098, %v973_v14  }
  0x41   : > { %409 = vmatpush.msra.mxu0 %v351_v24  ;;  %1008 = vmatpush.msra.mxu3 %v360_v16 }
  0x42   : > { %450 = vmatpush.msra.mxu1 %v352_v26  ;;  %997 = vmatpush.msra.mxu2 %v357_v17 }
  0x43   : > { %489 = vperm.xlu0 %1094, %v1477_v25   ;;  %410 = vmatpush.msra.mxu0 %v349_v27 }
  0x44   : > { %515 = vperm.xlu1 %1096, %v1446_v1   ;;  %451 = vmatpush.msra.mxu1 %v350_v28 }
  0x45   : > { %411 = vmatpush.msra.mxu0 %v347_v29  ;;  %1009 = vmatpush.msra.mxu3 %v358_v18 }
  0x46   : > { %452 = vmatpush.msra.mxu1 %v348_v30  ;;  %954 = vmatmul.msk.f32.vlgmr.msra.gmra.mxu0 %vm371_vm0, %v339_v31 }
  0x47   : > { %962 = vmatmul.msk.f32.vlgmr.msra.gmra.mxu1 %vm371_vm0, %v339_v31  ;;  %998 = vmatpush.msra.mxu2 %v355_v20 }
  0x48   : > { %1010 = vmatpush.msra.mxu3 %v356_v21  ;;  %1099 = vset.pattern.permute.xlu2 %v1291_v0 }
  0x49   : > { %999 = vmatpush.msra.mxu2 %v353_v22  ;;  %538 = vperm.xlu2 %1099, %v971_v33  }
  0x4a   : > { %1011 = vmatpush.msra.mxu3 %v354_v23 }
  0x4b   : > { %1100 = vset.pattern.permute.xlu0 %v1292_v15  ;;  %1000 = vmatpush.msra.mxu2 %v351_v24 }
  0x4c   : > { %1101 = vset.pattern.permute.xlu1 %v1291_v0  ;;  %564 = vperm.xlu0 %1100, %v972_v19  }
  0x4d   : > { %484 = vperm.xlu1 %1101, %v1497_v32   ;;  %1012 = vmatpush.msra.mxu3 %v352_v26 }
  0x4e   : > { %955 = vmatmul.msk.f32.gmra.mxu0 %vm371_vm0, %v340_v34  ;;  %1001 = vmatpush.msra.mxu2 %v349_v27 }
  0x4f   : > { %963 = vmatmul.msk.f32.gmra.mxu1 %vm371_vm0, %v340_v34  ;;  %1013 = vmatpush.msra.mxu3 %v350_v28 }
  0x50   : > { %1002 = vmatpush.msra.mxu2 %v347_v29 }
  0x51   : > { %1014 = vmatpush.msra.mxu3 %v348_v30  ;;  %1102 = vset.pattern.permute.xlu2 %v1292_v15 }
  0x52   : > { %511 = vperm.xlu2 %1102, %v1477_v25   ;;  %960 = vmatmul.msk.f32.vlgmr.msra.gmra.mxu2 %vm371_vm0, %v345_v55 }
  0x53   : > { %968 = vmatmul.msk.f32.vlgmr.msra.gmra.mxu3 %vm371_vm0, %v345_v55 }
  0x54   : > { %507 = vperm.xlu0 %1100, %v1497_v32  }
  0x55   : > { %533 = vperm.xlu1 %1101, %v970_v35  }
  0x56   : > { %956 = vmatmul.msk.f32.gmra.mxu0 %vm371_vm0, %v341_v36 }
  0x57   : > { %964 = vmatmul.msk.f32.gmra.mxu1 %vm371_vm0, %v341_v36 }
  0x5a   : > { %560 = vperm.xlu2 %1102, %v971_v33   ;;  %961 = vmatmul.msk.f32.gmra.mxu2 %vm371_vm0, %v346_v2 }
  0x5b   : > { %969 = vmatmul.msk.f32.gmra.mxu3 %vm371_vm0, %v346_v2 }
  0x5d   : > { %1103 = vset.pattern.permute.xlu1 %v1292_v15 }
  0x5e   : > { %556 = vperm.xlu1 %1103, %v970_v35   ;;  %957 = vmatmul.msk.f32.gmra.mxu0 %vm371_vm0, %v342_v37 }
  0x5f   : > { %965 = vmatmul.msk.f32.gmra.mxu1 %vm371_vm0, %v342_v37 }
  0x91   : > { %v544_v40 = vpop.permute.xlu2 %543 }
  0x9a   : > { %v1521_v43 = vpop.permute.xlu2 %568 }
  0xa3   : > { %v539_v46 = vpop.permute.xlu2 %538 }
  0xa5   : > { %v495_v38 = vpop.permute.xlu1 %494  ;;  %v500_v39 = vpop.permute.xlu0 %499 }
  0xac   : > { %v512_v49 = vpop.permute.xlu2 %511 }
  0xad   : > { %v549_v42 = vpop.permute.xlu0 %548 }
  0xae   : > { %v1519_v41 = vpop.permute.xlu1 %519 }
  0xb4   : > { %v561_v59 = vpop.permute.xlu2 %560 }
  0xb5   : > { %v490_v45 = vpop.permute.xlu0 %489 }
  0xb6   : > { %v516_v44 = vpop.permute.xlu1 %515 }
  0xbe   : > { %v565_v48 = vpop.permute.xlu0 %564 }
  0xbf   : > { %v485_v47 = vpop.permute.xlu1 %484 }
  0xc3   : > { %v413_v51 = vpop.f32.mrf.mxu0 }
  0xc4   : > { %v454_v52 = vpop.f32.mrf.mxu1  ;;  %v502_v53 = vmul.f32 %v485_v47, %v413_v51 }
  0xc6   : > { %v508_v54 = vpop.permute.xlu0 %507 }
  0xc7   : > { %v534_v50 = vpop.permute.xlu1 %533  ;;  %v522_v56 = vadd.f32 %v508_v54, %v502_v53 }
  0xc8   : > { %v551_v57 = vmul.f32 %v534_v50, %v454_v52 }
  0xc9   : > { %v575_v3 = vmax.f32 %v522_v56, -30.0 }
  0xcb   : > { %v416_v58 = vpop.f32.mrf.mxu0  ;;  %v583_v10 = vsub.f32 0.0, %v575_v3 }
  0xcc   : > { %v503_v60 = vmul.f32 %v490_v45, %v416_v58  ;;  %v457_v61 = vpop.f32.mrf.mxu1 }
  0xcd   : > { %v552_v63 = vmul.f32 %v539_v46, %v457_v61  ;;  %v591_v18 = vmul.f32 1.442695, %v583_v10 }
  0xce   : > { %v523_v4 = vadd.f32 %v512_v49, %v503_v60 }
  0xcf   : > { %v572_v7 = vadd.f32 %v561_v59, %v552_v63  ;;  %1107 = vpow2.f32 %v591_v18  ;;  %v344_v18 = vld [vmem:[%s1487_s10 + $0x28] sm:$0xff] }
  0xd0   : > { %v557_v62 = vpop.permute.xlu1 %556  ;;  %v577_v8 = vmax.f32 %v523_v4, -30.0  ;;  %v343_v4 = vld [vmem:[%s1487_s10 + $0x20] sm:$0xff] }
  0xd1   : > { %v571_v0 = vadd.f32 %v557_v62, %v551_v57  ;;  %v578_v9 = vmax.f32 %v572_v7, -30.0  ;;  %958 = vmatmul.msk.f32.gmra.mxu0 %vm371_vm0, %v343_v4  ;;  %966 = vmatmul.msk.f32.gmra.mxu1 %vm371_vm0, %v343_v4 }
  0xd2   : > { %v585_v13 = vsub.f32 0.0, %v577_v8 }
  0xd3   : > { %v576_v5 = vmax.f32 %v571_v0, -30.0  ;;  %v419_v12 = vpop.f32.mrf.mxu0  ;;  %v586_v16 = vsub.f32 0.0, %v578_v9 }
  0xd4   : > { %v504_v14 = vmul.f32 %v495_v38, %v419_v12  ;;  %v460_v15 = vpop.f32.mrf.mxu1  ;;  %v595_v22 = vmul.f32 1.442695, %v585_v13 }
  0xd5   : > { %v584_v11 = vsub.f32 0.0, %v576_v5  ;;  %v553_v17 = vmul.f32 %v544_v40, %v460_v15  ;;  %v597_v24 = vmul.f32 1.442695, %v586_v16  ;;  %v1531_v38 = vpop.eup %1107 }
  0xd6   : > { %v524_v19 = vadd.f32 %v516_v44, %v504_v14  ;;  %v607_v55 = vmul.f32 %v1531_v38, %v1531_v38 }
  0xd7   : > { %v593_v20 = vmul.f32 1.442695, %v584_v11  ;;  %v573_v21 = vadd.f32 %v565_v48, %v553_v17 }
  0xd8   : > { %v579_v23 = vmax.f32 %v524_v19, -30.0  ;;  %v615_v60 = vadd.f32 1.0, %v607_v55 }
  0xd9   : > { %v580_v26 = vmax.f32 %v573_v21, -30.0  ;;  %1109 = vpow2.f32 %v593_v20  ;;  %959 = vmatmul.msk.f32.gmra.mxu0 %vm371_vm0, %v344_v18  ;;  %967 = vmatmul.msk.f32.gmra.mxu1 %vm371_vm0, %v344_v18 }
  0xda   : > { %v587_v27 = vsub.f32 0.0, %v579_v23  ;;  %1111 = vpow2.f32 %v595_v22 }
  0xdb   : > { %v588_v28 = vsub.f32 0.0, %v580_v26  ;;  %v422_v29 = vpop.f32.mrf.mxu0  ;;  %1113 = vpow2.f32 %v597_v24 }
  0xdc   : > { %v599_v30 = vmul.f32 1.442695, %v587_v27  ;;  %v505_v31 = vmul.f32 %v500_v39, %v422_v29  ;;  %v463_v33 = vpop.f32.mrf.mxu1 }
  0xdd   : > { %v601_v34 = vmul.f32 1.442695, %v588_v28  ;;  %v554_v35 = vmul.f32 %v549_v42, %v463_v33 }
  0xde   : > { %1115 = vpow2.f32 %v599_v30  ;;  %v525_v36 = vadd.f32 %v1519_v41, %v505_v31 }
  0xdf   : > { %1117 = vpow2.f32 %v601_v34  ;;  %v574_v37 = vadd.f32 %v1521_v43, %v554_v35  ;;  %v1533_v44 = vpop.eup %1109 }
  0xe0   : > { %v581_v40 = vmax.f32 %v525_v36, -30.0  ;;  %v1535_v46 = vpop.eup %1111  ;;  %v608_v57 = vmul.f32 %v1533_v44, %v1533_v44 }
  0xe1   : > { %v582_v45 = vmax.f32 %v574_v37, -30.0  ;;  %v1537_v39 = vpop.eup %1113  ;;  %v609_v51 = vmul.f32 %v1535_v46, %v1535_v46 }
  0xe2   : > { %v589_v47 = vsub.f32 0.0, %v581_v40  ;;  %v610_v53 = vmul.f32 %v1537_v39, %v1537_v39  ;;  %v616_v62 = vadd.f32 1.0, %v608_v57 }
  0xe3   : > { %v590_v48 = vsub.f32 0.0, %v582_v45  ;;  %v617_v58 = vadd.f32 1.0, %v609_v51 }
  0xe4   : > { %v1539_v49 = vpop.eup %1115  ;;  %v603_v42 = vmul.f32 1.442695, %v589_v47  ;;  %v618_v59 = vadd.f32 1.0, %v610_v53  ;;  %v657_v53 = vsub.f32 1.0, %v1535_v46 }
  0xe5   : > { %v1541_v50 = vpop.eup %1117  ;;  %v605_v41 = vmul.f32 1.442695, %v590_v48  ;;  %v611_v43 = vmul.f32 %v1539_v49, %v1539_v49  ;;  %v659_v48 = vsub.f32 1.0, %v1539_v49 }
  0xe6   : > { %1119 = vpow2.f32 %v603_v42  ;;  %v612_v52 = vmul.f32 %v1541_v50, %v1541_v50 }
  0xe7   : > { %1121 = vpow2.f32 %v605_v41  ;;  %v619_v54 = vadd.f32 1.0, %v611_v43  ;;  %v660_v43 = vsub.f32 1.0, %v1541_v50 }
  0xe8   : > { %v620_v56 = vadd.f32 1.0, %v612_v52 }
  0xe9   : > { %1123 = vrcp.f32 %v619_v54 }
  0xea   : > { %1125 = vrcp.f32 %v620_v56 }
  0xeb   : > { %1127 = vrcp.f32 %v617_v58 }
  0xec   : > { %v1120_v61 = vpop.eup %1119  ;;  %1129 = vrcp.f32 %v618_v59 }
  0xed   : > { %v1122_v63 = vpop.eup %1121  ;;  %v613_v0 = vmul.f32 %v1120_v61, %v1120_v61  ;;  %1131 = vrcp.f32 %v615_v60  ;;  %v661_v33 = vsub.f32 1.0, %v1120_v61  ;;  %v671_v61 = vld [vmem:[%s1424_s29] sm:$0xff] }
  0xee   : > { %v614_v2 = vmul.f32 %v1122_v63, %v1122_v63  ;;  %1133 = vrcp.f32 %v616_v62  ;;  %v662_v37 = vsub.f32 1.0, %v1122_v63 }
  0xef   : > { %v621_v3 = vadd.f32 1.0, %v613_v0  ;;  %v1124_v7 = vpop.eup %1123 }
  0xf0   : > { %v622_v5 = vadd.f32 1.0, %v614_v2  ;;  %v1126_v8 = vpop.eup %1125  ;;  %v635_v11 = vmul.f32 %v1124_v7, %v619_v54 }
  0xf1   : > { %1135 = vrcp.f32 %v621_v3  ;;  %v1128_v9 = vpop.eup %1127  ;;  %v636_v13 = vmul.f32 %v1126_v8, %v620_v56  ;;  %v658_v56 = vsub.f32 1.0, %v1537_v39 }
  0xf2   : > { %1137 = vrcp.f32 %v622_v5  ;;  %v1130_v10 = vpop.eup %1129  ;;  %v633_v15 = vmul.f32 %v1128_v9, %v617_v58  ;;  %v643_v21 = vsub.f32 2.0, %v635_v11  ;;  %v1293_v58 = vmov 2  }
  0xf3   : > { %v1132_v12 = vpop.eup %1131  ;;  %v634_v17 = vmul.f32 %v1130_v10, %v618_v59  ;;  %v644_v24 = vsub.f32 2.0, %v636_v13  ;;  %1106 = vset.pattern.permute.xlu1 %v1293_v58  ;;  %v655_v59 = vsub.f32 1.0, %v1531_v38  ;;  %1105 = vset.pattern.permute.xlu0 %v1293_v58  ;;  %v674_v38 = vld [vmem:[%s1424_s29 + $0x18] sm:$0xff] }
  0xf4   : > { %v1134_v14 = vpop.eup %1133  ;;  %v631_v22 = vmul.f32 %v1132_v12, %v615_v60  ;;  %v641_v28 = vsub.f32 2.0, %v633_v15  ;;  %v651_v34 = vmul.f32 %v1124_v7, %v643_v21  ;;  %v656_v60 = vsub.f32 1.0, %v1533_v44  ;;  %755 = vperm.xlu1 %1106, %v1446_v1   ;;  %751 = vperm.xlu0 %1105, %v1477_v25   ;;  %v672_v1 = vld [vmem:[%s1424_s29 + $0x8] sm:$0xff]  ;;  %v673_v25 = vld [vmem:[%s1424_s29 + $0x10] sm:$0xff]  ;;  %v472_v44 = vpop.f32.mrf.mxu3  ;;  %s1215_s29 = scalar_lea.hbm %s1214_s23, 64 }
  0xf5   : > { %v632_v26 = vmul.f32 %v1134_v14, %v616_v62  ;;  %v642_v30 = vsub.f32 2.0, %v634_v17  ;;  %v652_v40 = vmul.f32 %v1126_v8, %v644_v24  ;;  %1104 = vset.pattern.permute.xlu2 %v1293_v58  ;;  %p1216_p4 = scmp.ne.s32.totalorder %s1214_s23, %s1215_s29  ;;  %p1221_p8 = scmp.lt.s32.totalorder %s1219_s8, %s1215_s29 }
  0xf6   : > { %v639_v35 = vsub.f32 2.0, %v631_v22  ;;  %v649_v42 = vmul.f32 %v1128_v9, %v641_v28  ;;  %v667_v52 = vmul.f32 %v659_v48, %v651_v34  ;;  %747 = vperm.xlu2 %1104, %v1497_v32   ;;  %v431_v32 = vpop.f32.mrf.mxu2 }
  0xf7   : > { %v1136_v16 = vpop.eup %1135  ;;  %v640_v45 = vsub.f32 2.0, %v632_v26  ;;  %v650_v51 = vmul.f32 %v1130_v10, %v642_v30  ;;  %v668_v55 = vmul.f32 %v660_v43, %v652_v40  ;;  %p1217_p5 = pnand %p1216_p4, %p1372_p9  ;;  %p1222_p10 = por %p1221_p8, %p1220_p7 }
  0xf8   : > { %v1138_v19 = vpop.eup %1137  ;;  %v637_v20 = vmul.f32 %v1136_v16, %v621_v3  ;;  %v647_v54 = vmul.f32 %v1132_v12, %v639_v35  ;;  %v665_v49 = vmul.f32 %v657_v53, %v649_v42 }
  0xf9   : > { %v638_v23 = vmul.f32 %v1138_v19, %v622_v5  ;;  %v648_v57 = vmul.f32 %v1134_v14, %v640_v45  ;;  %v666_v50 = vmul.f32 %v658_v56, %v650_v51  ;;  %p1218_p6 = pneg %p1217_p5 }
  0xfa   : > { %v645_v27 = vsub.f32 2.0, %v637_v20  ;;  %v663_v46 = vmul.f32 %v655_v59, %v647_v54 }
  0xfb   : > { %v646_v29 = vsub.f32 2.0, %v638_v23  ;;  %v664_v39 = vmul.f32 %v656_v60, %v648_v57  ;;  %p1223_p12 = pnand %p1222_p10, %p1218_p6 }
  0xfc   : > { %v653_v31 = vmul.f32 %v1136_v16, %v645_v27  ;;  %v475_v63 = vpop.f32.mrf.mxu3 }
  0xfd   : > { %v654_v36 = vmul.f32 %v1138_v19, %v646_v29 }
  0xfe   : > { %v669_v47 = vmul.f32 %v661_v33, %v653_v31  ;;  %759 = vperm.xlu2 %1104, %v1454_v6   ;;  %v434_v62 = vpop.f32.mrf.mxu2 }
  0xff   : > { %v670_v41 = vmul.f32 %v662_v37, %v654_v36 }
 0x100   : > { %700 = vmatpush.msrb.mxu2 %v669_v47 }
 0x101   : > { %729 = vmatpush.msrb.mxu3 %v670_v41 }
 0x102   : > { %701 = vmatpush.msrb.mxu2 %v667_v52 }
 0x103   : > { %730 = vmatpush.msrb.mxu3 %v668_v55 }
 0x104   : > { %702 = vmatpush.msrb.mxu2 %v665_v49 }
 0x105   : > { %731 = vmatpush.msrb.mxu3 %v666_v50 }
 0x106   : > { %703 = vmatpush.msrb.mxu2 %v663_v46 }
 0x107   : > { %732 = vmatpush.msrb.mxu3 %v664_v39  ;;  %974 = vmatmul.msk.f32.vlgmr.msrb.gmra.mxu2 %vm675_vm1, %v671_v61 }
 0x108   : > { %978 = vmatmul.msk.f32.vlgmr.msrb.gmra.mxu3 %vm675_vm1, %v671_v61 }
 0x10f   : > { %975 = vmatmul.msk.f32.gmra.mxu2 %vm675_vm1, %v672_v1 }
 0x110   : > { %979 = vmatmul.msk.f32.gmra.mxu3 %vm675_vm1, %v672_v1 }
 0x117   : > { %976 = vmatmul.msk.f32.gmra.mxu2 %vm675_vm1, %v673_v25 }
 0x118   : > { %980 = vmatmul.msk.f32.gmra.mxu3 %vm675_vm1, %v673_v25 }
 0x11f   : > { %977 = vmatmul.msk.f32.gmra.mxu2 %vm675_vm1, %v674_v38 }
 0x120   : > { %981 = vmatmul.msk.f32.gmra.mxu3 %vm675_vm1, %v674_v38 }
 0x14e   : > { %v425_v0 = vpop.f32.mrf.mxu0  ;;  %v466_v6 = vpop.f32.mrf.mxu1 }
 0x150   : > { %v748_v3 = vpop.permute.xlu2 %747 }
 0x156   : > { %v428_v10 = vpop.f32.mrf.mxu0  ;;  %v469_v11 = vpop.f32.mrf.mxu1 }
 0x158   : > { %v760_v31 = vpop.permute.xlu2 %759 }
 0x166   : > { %v752_v13 = vpop.permute.xlu0 %751  ;;  %v756_v20 = vpop.permute.xlu1 %755 }
 0x18a   : > { %v705_v2 = vpop.f32.mrf.mxu2 }
 0x18b   : > { %v734_v4 = vpop.f32.mrf.mxu3  ;;  %v706_v5 = vadd.f32 %v705_v2, %v425_v0 }
 0x18c   : > { %v735_v7 = vadd.f32 %v734_v4, %v466_v6 }
 0x18d   : > { %v762_v8 = vadd.f32 %v748_v3, %v706_v5 }
 0x18e   : > { %v763_v9 = vadd.f32 %v748_v3, %v735_v7 }
 0x18f   : > { %770 = vst [vmem:[%s1584_s7] sm:$0xff] %v762_v8 }
 0x190   : > { %771 = vst [vmem:[%s1584_s7 + $0x8] sm:$0xff] %v763_v9 }
 0x192   : > { %v708_v12 = vpop.f32.mrf.mxu2 }
 0x193   : > { %v737_v14 = vpop.f32.mrf.mxu3  ;;  %v709_v15 = vadd.f32 %v708_v12, %v428_v10 }
 0x194   : > { %v738_v16 = vadd.f32 %v737_v14, %v469_v11 }
 0x195   : > { %v764_v17 = vadd.f32 %v752_v13, %v709_v15 }
 0x196   : > { %v765_v18 = vadd.f32 %v752_v13, %v738_v16 }
 0x197   : > { %772 = vst [vmem:[%s1584_s7 + $0x10] sm:$0xff] %v764_v17 }
 0x198   : > { %773 = vst [vmem:[%s1584_s7 + $0x18] sm:$0xff] %v765_v18 }
 0x19a   : > { %v711_v19 = vpop.f32.mrf.mxu2 }
 0x19b   : > { %v712_v21 = vadd.f32 %v711_v19, %v431_v32  ;;  %v740_v22 = vpop.f32.mrf.mxu3 }
 0x19c   : > { %v741_v23 = vadd.f32 %v740_v22, %v472_v44 }
 0x19d   : > { %v766_v24 = vadd.f32 %v756_v20, %v712_v21 }
 0x19e   : > { %v767_v26 = vadd.f32 %v756_v20, %v741_v23 }
 0x19f   : > { %774 = vst [vmem:[%s1584_s7 + $0x20] sm:$0xff] %v766_v24 }
 0x1a0   : > { %775 = vst [vmem:[%s1584_s7 + $0x28] sm:$0xff] %v767_v26 }
 0x1a2   : > { %v714_v27 = vpop.f32.mrf.mxu2 }
 0x1a3   : > { %v715_v28 = vadd.f32 %v714_v27, %v434_v62  ;;  %v743_v29 = vpop.f32.mrf.mxu3 }
 0x1a4   : > { %v744_v30 = vadd.f32 %v743_v29, %v475_v63 }
 0x1a5   : > { %v768_v33 = vadd.f32 %v760_v31, %v715_v28 }
 0x1a6   : > { %v769_v34 = vadd.f32 %v760_v31, %v744_v30 }
 0x1a7   : > { %776 = vst [vmem:[%s1584_s7 + $0x30] sm:$0xff] %v768_v33 }
 0x1a8   : > { %777 = vst [vmem:[%s1584_s7 + $0x38] sm:$0xff] %v769_v34 }
 0x1a9   : > { %1226 = shalt.err (!%p1223_p12)
}
 0x1aa   : > { %s1294_s13 = smov 256   ;;  %s1295_s26 = smov 16  }
 0x1ab   : > { %1022 = dma.vmem_to_hbm [thread:$0]  (%p1372_p9), %s794_s22, 1024, %s796_s0, %s779_s18, %s1294_s13, %s1294_s13, %s1295_s26  }
 0x1ac PF: > { %p1036_p13 = scmp.ge.s32.totalorder %s1285_s20, 2  ;;  %s810_s9 = sand.u32 1, %s1265_s15  }
 0x1ad   : > { %s811_s10 = scalar_lea.sflag [#allocation4], %s810_s9 }
 0x1ae   : > { %p1032_p0 = pnand %p1036_p13, %p1379_p11 }
 0x1b0   : > { %p1033_p1 = pneg %p1032_p0 }
 0x1b2   : > { %1260 = dma.done.wait (%p1033_p1), %s811_s10, 1024  }
 0x1b3   : > { %1262 = vsyncadd (%p1033_p1), %s811_s10, 4294966272  ;;  %s23_s20 = sadd.s32 1, %s1285_s20   ;;  %s1647_s6 = sld [smem:[#allocation12_spill]] }
 0x1b4   : > { %p20_p2 = scmp.ge.s32.totalorder %s23_s20, 5   ;;  %s1648_s28 = sld [smem:[#allocation11_spill]] }
 0x1b5   : > { %s1649_s15 = smov %s1269_s16  ;;  %s1650_s16 = smov %s1273_s17 }
 0x1b6   : > { %s1652_s18 = smov %s1281_s19  ;;  %22 = sbr.rel (!%p20_p2) target bundleno = 10 (0xa), region = 101 }
 0x1b9   : > { %s1651_s17 = smov %s1647_s6 }
 0x1ba   : > { %s1653_s19 = smov %s1648_s28 }
 0x1bb   :  { %817 = vsyncpa [#allocation3], 1 }
 0x1bc   :  { %819 = vsyncpa [#allocation3 + $0x1], 1 }
 0x1bd   :  { %820 = vsyncpa [#allocation6], 1 }
 0x1be   :  { %822 = vsyncpa [#allocation6 + $0x1], 1 }
 0x1bf   :  { %823 = vsyncpa [#allocation4], 1 }
 0x1c0   :  { %825 = vsyncpa [#allocation4 + $0x1], 1 }

</bundles_post_ra>
